<compile_context>
chip_gen: v6e
topology: v6e:2x2x1
jax: 0.10.0
libtpu: 0.0.40
codegen_flags: <defaults>
</compile_context>

<pallas_src>
import jax
import jax.numpy as jnp
import numpy as np
from jax.experimental import pallas as pl
from jax.experimental.pallas import tpu as pltpu


def _round_up(x, m):
    return ((x + m - 1) // m) * m


def _make_focal_kernel(*, gamma, alpha, has_weight, reduce_only, n_valid, tile_n,
                       num_classes, needs_mask):
    gamma = float(gamma)
    alpha = float(alpha)

    def kernel(*refs):
        if has_weight:
            pred_ref, tgt_ref, w_ref, out_ref = refs
        else:
            pred_ref, tgt_ref, out_ref = refs
            w_ref = None

        x = pred_ref[...].astype(jnp.float32)             # pred.float()
        labels = tgt_ref[...]                             # (tile_n, 1) int32

        # One-hot target; label == num_classes (background) -> all-zero row.
        cls_ids = jax.lax.broadcasted_iota(jnp.int32, x.shape, 1)
        t = (cls_ids == labels).astype(jnp.float32)

        # Share one exp between the stable BCE term and the sigmoid.
        e = jnp.exp(-jnp.abs(x))
        ce = jnp.maximum(x, 0.0) - x * t + jnp.log1p(e)    # BCE-with-logits
        inv = 1.0 / (1.0 + e)
        p = jnp.where(x >= 0.0, inv, e * inv)              # sigmoid(x)

        p_t = p * t + (1.0 - p) * (1.0 - t)
        one_m = 1.0 - p_t

        # (1 - p_t) ** gamma : repeated multiply for small integer gamma (EUP-free).
        if gamma == round(gamma) and 0.0 <= gamma <= 4.0:
            gi = int(round(gamma))
            if gi == 0:
                loss = ce
            else:
                mod = one_m
                for _ in range(gi - 1):
                    mod = mod * one_m
                loss = ce * mod
        else:
            loss = ce * jnp.power(one_m, gamma)

        if alpha >= 0:
            alpha_t = alpha * t + (1.0 - alpha) * (1.0 - t)
            loss = alpha_t * loss

        if has_weight:
            loss = loss * w_ref[...]                       # weight.view(-1, 1)

        if needs_mask:
            # Rows beyond N (tail tile of a non-divisible grid) contribute zero.
            row = (jax.lax.broadcasted_iota(jnp.int32, x.shape, 0)
                   + pl.program_id(0) * tile_n)
            loss = jnp.where(row < n_valid, loss, 0.0)

        if reduce_only:
            # Per-(sublane, lane) partial sums -> (8, C) block; no cross-lane XLU
            # reduce in-kernel, final scalar sum happens in the wrapper.
            r = loss.reshape(tile_n // 8, 8, num_classes).sum(axis=0)
            out_ref[...] = r
        else:
            out_ref[...] = loss.astype(out_ref.dtype)

    return kernel


def _sigmoid_focal_loss_pallas(pred, target, weight, gamma, alpha, *,
                               reduce_only, tile_n=1024):
    """Returns a scalar total (reduce_only=True) or the (N, C) weighted loss."""
    n, c = pred.shape
    tile = min(int(tile_n), _round_up(n, 8))
    tile = max(_round_up(tile, 8), 8)
    grid = pl.cdiv(n, tile)
    needs_mask = (n % tile) != 0

    target2d = target.astype(jnp.int32).reshape(n, 1)
    has_weight = weight is not None

    inputs = [pred, target2d]
    in_specs = [
        pl.BlockSpec((tile, c), lambda i: (i, 0)),
        pl.BlockSpec((tile, 1), lambda i: (i, 0)),
    ]
    bytes_accessed = n * c * pred.dtype.itemsize + n * 4
    if has_weight:
        inputs.append(weight.astype(jnp.float32).reshape(n, 1))
        in_specs.append(pl.BlockSpec((tile, 1), lambda i: (i, 0)))
        bytes_accessed += n * 4

    if reduce_only:
        out_shape = jax.ShapeDtypeStruct((grid * 8, c), jnp.float32)
        out_specs = pl.BlockSpec((8, c), lambda i: (i, 0))
        bytes_accessed += grid * 8 * c * 4
    else:
        out_shape = jax.ShapeDtypeStruct((n, c), jnp.float32)
        out_specs = pl.BlockSpec((tile, c), lambda i: (i, 0))
        bytes_accessed += n * c * 4

    kernel = _make_focal_kernel(
        gamma=gamma, alpha=alpha, has_weight=has_weight, reduce_only=reduce_only,
        n_valid=n, tile_n=tile, num_classes=c, needs_mask=needs_mask)

    out = pl.pallas_call(
        kernel,
        out_shape=out_shape,
        grid_spec=pltpu.PrefetchScalarGridSpec(
            num_scalar_prefetch=0,
            grid=(grid,),
            in_specs=in_specs,
            out_specs=out_specs,
        ),
        compiler_params=pltpu.CompilerParams(
            dimension_semantics=("parallel",)),    # independent tiles -> megacore OK
        cost_estimate=pl.CostEstimate(
            flops=15 * n * c,
            transcendentals=3 * n * c,
            bytes_accessed=int(bytes_accessed)),
    )(*inputs)

    if reduce_only:
        return jnp.sum(out)     # scalar total of the (weighted) elementwise loss
    return out                  # (N, C) elementwise weighted loss


class FocalLoss:
    """JAX/Pallas equivalent of mmdet FocalLoss (use_sigmoid=True only)."""

    def __init__(self, use_sigmoid=True, gamma=2.0, alpha=0.25,
                 reduction='mean', loss_weight=1.0):
        assert use_sigmoid is True, 'Only sigmoid focal loss supported now.'
        self.use_sigmoid = use_sigmoid
        self.gamma = gamma
        self.alpha = alpha
        self.reduction = reduction
        self.loss_weight = loss_weight

    def __call__(self, pred, target, weight=None, avg_factor=None,
                 reduction_override=None):
        assert reduction_override in (None, 'none', 'mean', 'sum')
        reduction = reduction_override if reduction_override else self.reduction
        n, c = pred.shape

        if reduction == 'none':
            loss = _sigmoid_focal_loss_pallas(
                pred, target, weight, self.gamma, self.alpha, reduce_only=False)
            return self.loss_weight * loss

        # 'mean' / 'sum': reduce-only kernel (no (N, C) elementwise HBM write).
        if reduction == 'sum' and avg_factor is not None:
            raise ValueError('avg_factor can not be used with reduction="sum"')
        total = _sigmoid_focal_loss_pallas(
            pred, target, weight, self.gamma, self.alpha, reduce_only=True)
        if reduction == 'mean':
            denom = avg_factor if avg_factor is not None else (n * c)
            total = total / denom
        return self.loss_weight * total


def _reference_elem(pred, target, weight, gamma, alpha):
    """Pure-JAX elementwise reference (weighted, no reduction)."""
    pred = pred.astype(jnp.float32)
    n, c = pred.shape
    t = jax.nn.one_hot(target, c + 1, dtype=jnp.float32)[:, :c]
    p = jax.nn.sigmoid(pred)
    ce = jnp.maximum(pred, 0.0) - pred * t + jnp.log1p(jnp.exp(-jnp.abs(pred)))
    p_t = p * t + (1 - p) * (1 - t)
    loss = ce * (1 - p_t) ** gamma
    if alpha >= 0:
        alpha_t = alpha * t + (1 - alpha) * (1 - t)
        loss = alpha_t * loss
    if weight is not None:
        loss = loss * weight.reshape(-1, 1)
    return loss


if __name__ == "__main__":
    # Small shapes consistent with the module: (N, C) logits, C = 80 classes
    # (hardcoded in the original _sigmoid_focal_loss via the [:, :80] slice).
    N, C = 32, 80
    key = jax.random.PRNGKey(0)
    k1, k2, k3, k4, k5 = jax.random.split(key, 5)
    pred = jax.random.normal(k1, (N, C), dtype=jnp.float32)
    # labels in [0, C]; label == C means background (all-zero one-hot row)
    target = jax.random.randint(k2, (N,), 0, C + 1, dtype=jnp.int32)

    focal = FocalLoss(use_sigmoid=True, gamma=2.0, alpha=0.25,
                      reduction='mean', loss_weight=1.0)

    # 1) 'mean' reduction, no weight -> reduce-only kernel path.
    out_mean = jax.block_until_ready(focal(pred, target))
    ref_mean = _reference_elem(pred, target, None, 2.0, 0.25).mean()
    np.testing.assert_allclose(np.asarray(out_mean), np.asarray(ref_mean),
                               rtol=5e-5, atol=1e-6)

    # 2) 'none' reduction -> elementwise kernel path.
    out_none = jax.block_until_ready(focal(pred, target, reduction_override='none'))
    ref_none = _reference_elem(pred, target, None, 2.0, 0.25)
    np.testing.assert_allclose(np.asarray(out_none), np.asarray(ref_none),
                               rtol=5e-5, atol=1e-6)

    # 3) Ragged N + sample weight + avg_factor -> masked tail tile, weighted path.
    N2 = 37
    pred2 = jax.random.normal(k3, (N2, C), dtype=jnp.float32)
    target2 = jax.random.randint(k4, (N2,), 0, C + 1, dtype=jnp.int32)
    w2 = jax.random.uniform(k5, (N2,), dtype=jnp.float32)
    out_w = jax.block_until_ready(focal(pred2, target2, weight=w2, avg_factor=12.5))
    ref_w = _reference_elem(pred2, target2, w2, 2.0, 0.25).sum() / 12.5
    np.testing.assert_allclose(np.asarray(out_w), np.asarray(ref_w),
                               rtol=5e-5, atol=1e-6)

    print("KERNEL_OK")
</pallas_src>

<mosaic_0001>
module attributes {stable_mosaic.version = 11 : i64} {
  func.func @kernel(%arg0: i32, %arg1: memref<32x80xf32, #tpu.memory_space<vmem>>, %arg2: memref<32x1xi32, #tpu.memory_space<vmem>>, %arg3: memref<8x80xf32, #tpu.memory_space<vmem>>) attributes {dimension_semantics = [#tpu.dimension_semantics<parallel>], iteration_bounds = array<i64: 1>, scalar_prefetch = 0 : i64, scratch_operands = 0 : i64, tpu.core_type = #tpu.core_type<tc>, window_params = [{transform_indices = @transform_0, window_bounds = array<i64: 32, 80>}, {transform_indices = @transform_1, window_bounds = array<i64: 32, 1>}, {transform_indices = @transform_2, window_bounds = array<i64: 8, 80>}]} {
    %c0 = arith.constant 0 : index
    %c0_0 = arith.constant 0 : index
    %0 = vector.load %arg1[%c0, %c0_0] : memref<32x80xf32, #tpu.memory_space<vmem>>, vector<32x80xf32>
    %c0_1 = arith.constant 0 : index
    %c0_2 = arith.constant 0 : index
    %1 = vector.load %arg2[%c0_1, %c0_2] : memref<32x1xi32, #tpu.memory_space<vmem>>, vector<32x1xi32>
    %2 = tpu.iota {dimensions = array<i32: 1>} : vector<32x80xi32>
    %3 = vector.broadcast %1 : vector<32x1xi32> to vector<32x80xi32>
    %4 = arith.cmpi eq, %2, %3 : vector<32x80xi32>
    %5 = arith.extui %4 : vector<32x80xi1> to vector<32x80xi32>
    %6 = arith.sitofp %5 : vector<32x80xi32> to vector<32x80xf32>
    %7 = math.absf %0 : vector<32x80xf32>
    %cst = arith.constant 0.000000e+00 : f32
    %8 = vector.broadcast %cst : f32 to vector<32x80xf32>
    %9 = arith.subf %8, %7 : vector<32x80xf32>
    %10 = math.exp %9 : vector<32x80xf32>
    %cst_3 = arith.constant 0.000000e+00 : f32
    %11 = vector.broadcast %cst_3 : f32 to vector<32x80xf32>
    %12 = arith.maximumf %0, %11 : vector<32x80xf32>
    %13 = arith.mulf %0, %6 : vector<32x80xf32>
    %14 = arith.subf %12, %13 : vector<32x80xf32>
    %15 = math.log1p %10 : vector<32x80xf32>
    %16 = arith.addf %14, %15 : vector<32x80xf32>
    %cst_4 = arith.constant 1.000000e+00 : f32
    %17 = vector.broadcast %cst_4 : f32 to vector<32x80xf32>
    %18 = arith.addf %17, %10 : vector<32x80xf32>
    %cst_5 = arith.constant 1.000000e+00 : f32
    %19 = vector.broadcast %cst_5 : f32 to vector<32x80xf32>
    %20 = arith.divf %19, %18 : vector<32x80xf32>
    %cst_6 = arith.constant 0.000000e+00 : f32
    %21 = vector.broadcast %cst_6 : f32 to vector<32x80xf32>
    %22 = arith.cmpf oge, %0, %21 : vector<32x80xf32>
    %23 = arith.mulf %10, %20 : vector<32x80xf32>
    %24 = arith.select %22, %20, %23 : vector<32x80xi1>, vector<32x80xf32>
    %25 = arith.mulf %24, %6 : vector<32x80xf32>
    %cst_7 = arith.constant 1.000000e+00 : f32
    %26 = vector.broadcast %cst_7 : f32 to vector<32x80xf32>
    %27 = arith.subf %26, %24 : vector<32x80xf32>
    %cst_8 = arith.constant 1.000000e+00 : f32
    %28 = vector.broadcast %cst_8 : f32 to vector<32x80xf32>
    %29 = arith.subf %28, %6 : vector<32x80xf32>
    %30 = arith.mulf %27, %29 : vector<32x80xf32>
    %31 = arith.addf %25, %30 : vector<32x80xf32>
    %cst_9 = arith.constant 1.000000e+00 : f32
    %32 = vector.broadcast %cst_9 : f32 to vector<32x80xf32>
    %33 = arith.subf %32, %31 : vector<32x80xf32>
    %34 = arith.mulf %33, %33 : vector<32x80xf32>
    %35 = arith.mulf %16, %34 : vector<32x80xf32>
    %cst_10 = arith.constant 2.500000e-01 : f32
    %36 = vector.broadcast %cst_10 : f32 to vector<32x80xf32>
    %37 = arith.mulf %36, %6 : vector<32x80xf32>
    %cst_11 = arith.constant 1.000000e+00 : f32
    %38 = vector.broadcast %cst_11 : f32 to vector<32x80xf32>
    %39 = arith.subf %38, %6 : vector<32x80xf32>
    %cst_12 = arith.constant 7.500000e-01 : f32
    %40 = vector.broadcast %cst_12 : f32 to vector<32x80xf32>
    %41 = arith.mulf %40, %39 : vector<32x80xf32>
    %42 = arith.addf %37, %41 : vector<32x80xf32>
    %43 = arith.mulf %42, %35 : vector<32x80xf32>
    %44 = vector.shape_cast %43 : vector<32x80xf32> to vector<4x8x80xf32>
    %cst_13 = arith.constant dense<0.000000e+00> : vector<8x80xf32>
    %45 = vector.multi_reduction <add>, %44, %cst_13 [0] : vector<4x8x80xf32> to vector<8x80xf32>
    %c0_14 = arith.constant 0 : index
    %c0_15 = arith.constant 0 : index
    %46 = vector.load %arg3[%c0_14, %c0_15] : memref<8x80xf32, #tpu.memory_space<vmem>>, vector<8x80xf32>
    tpu.vector_store %arg3[%c0_14, %c0_15], %45 {strides = array<i32>} : memref<8x80xf32, #tpu.memory_space<vmem>>, vector<8x80xf32>,
    return
  }
  func.func @transform_0(%arg0: i32) -> (i32, i32) {
    %c0_i32 = arith.constant 0 : i32
    %c0_i32_0 = arith.constant 0 : i32
    return %arg0, %c0_i32 : i32, i32
  }
  func.func @transform_1(%arg0: i32) -> (i32, i32) {
    %c0_i32 = arith.constant 0 : i32
    %c0_i32_0 = arith.constant 0 : i32
    return %arg0, %c0_i32 : i32, i32
  }
  func.func @transform_2(%arg0: i32) -> (i32, i32) {
    %c0_i32 = arith.constant 0 : i32
    %c0_i32_0 = arith.constant 0 : i32
    return %arg0, %c0_i32 : i32, i32
  }
}

</mosaic_0001>

<bundles_post_ra>
// kernel: tpu_custom_call.1
= control target key start
LH: loop header
LB: loop body
LE: loop exit
PB: predicated region body
PF: predicated region fallthrough
CT: control target
= control target key end

     0   :  { %v264_v2 = vmov 0   ;;  %s425_s0 = inlined_call_operand.vmem [shape: f32[32,80], index: 0, kind: input, shape index: {}]   ;;  %s426_s1 = inlined_call_operand.vmem [shape: s32[32,1], index: 1, kind: input, shape index: {}]   ;;  %s427_s2 = inlined_call_operand.hbm [shape: f32[8,80], index: 2, kind: output, shape index: {}]  }
   0x1   :  { %v18_v0 = vld [vmem:[%s426_s1 + $0x10] sm:$0xff]  ;;  %v16_v1 = vld [vmem:[%s426_s1] sm:$0xff]  ;;  %217 = vset.pattern.permute.xlu1 %v264_v2  ;;  %216 = vset.pattern.permute.xlu0 %v264_v2  ;;  %v19_v3 = vld [vmem:[%s426_s1 + $0x18] sm:$0xff] }
   0x2   :  { %29 = vperm.xlu1 %217, %v18_v0   ;;  %23 = vperm.xlu0 %216, %v16_v1   ;;  %v17_v4 = vld [vmem:[%s426_s1 + $0x8] sm:$0xff] }
   0x3   :  { %7 = vsyncpa [#allocation3], 0  ;;  %v297_v5 = vld [vmem:[%s425_s0 + $0x10] sm:$0xff]  ;;  %v302_v6 = vld [vmem:[%s425_s0] sm:$0xff]  ;;  %v20_v31 = vlaneseq  ;;  %v265_v50 = vmov 0.0   ;;  %vm186_vm12 = vcmask 654336  }
   0x4   :  { %v48_v7 = vand.u32 2147483647, %v297_v5  ;;  %v46_v8 = vand.u32 2147483647, %v302_v6  ;;  %v309_v9 = vld [vmem:[%s425_s0 + $0x18] sm:$0xff]  ;;  %v315_v14 = vld [vmem:[%s425_s0 + $0x8] sm:$0xff] }
   0x5   :  { %v49_v12 = vand.u32 2147483647, %v309_v9  ;;  %v47_v17 = vand.u32 2147483647, %v315_v14  ;;  %vm128_vm0 = vcmp.ge.f32.partialorder %v297_v5, 0.0  ;;  %vm126_vm1 = vcmp.ge.f32.partialorder %v302_v6, 0.0 }
   0x6   :  { %32 = vperm.xlu1 %217, %v19_v3   ;;  %26 = vperm.xlu0 %216, %v17_v4   ;;  %v52_v10 = vsub.f32 0.0, %v48_v7  ;;  %v50_v11 = vsub.f32 0.0, %v46_v8  ;;  %v334_v35 = vand.u32 127, %v20_v31  ;;  %v64_v36 = vmax.f32 %v297_v5, 0.0  ;;  %s266_s0 = smov [#allocation2]  }
   0x7   :  { %v53_v16 = vsub.f32 0.0, %v49_v12  ;;  %v51_v19 = vsub.f32 0.0, %v47_v17  ;;  %v62_v38 = vmax.f32 %v302_v6, 0.0  ;;  %vm129_vm2 = vcmp.ge.f32.partialorder %v309_v9, 0.0  ;;  %s201_s24 = sshll.u32 %s266_s0, 4  ;;  %s202_s24 = int_to_ptr.vmem [resolvable:$true] %s201_s24 }
   0x8   :  { %v58_v13 = vmul.f32 1.442695, %v52_v10  ;;  %v54_v15 = vmul.f32 1.442695, %v50_v11  ;;  %v65_v45 = vmax.f32 %v309_v9, 0.0  ;;  %vm127_vm3 = vcmp.ge.f32.partialorder %v315_v14, 0.0  ;;  %p247_p1 = scmp.lt.s32.totalorder %s202_s24, %s202_s24 }
   0x9   :  { %v60_v18 = vmul.f32 1.442695, %v53_v16  ;;  %v56_v20 = vmul.f32 1.442695, %v51_v19  ;;  %v63_v48 = vmax.f32 %v315_v14, 0.0  ;;  %s242_s25 = scalar_lea.vmem %s202_s24, 128 }
   0xa   :  { %218 = vpow2.f32 %v58_v13  ;;  %p243_p0 = scmp.ne.s32.totalorder %s202_s24, %s242_s25  ;;  %p248_p2 = scmp.lt.s32.totalorder %s242_s25, %s242_s25 }
   0xb   :  { %220 = vpow2.f32 %v54_v15 }
   0xc   :  { %222 = vpow2.f32 %v60_v18  ;;  %p249_p3 = por %p248_p2, %p247_p1 }
   0xd   :  { %224 = vpow2.f32 %v56_v20 }
   0xe   :  { %p250_p4 = pnand %p249_p3, %p243_p0 }
  0x17   :  { %v318_v21 = vpop.eup %218 }
  0x18   :  { %v320_v22 = vpop.eup %220  ;;  %v92_v23 = vadd.f32 1.0, %v318_v21  ;;  %v95_v37 = vmul.f32 -0.5, %v318_v21  ;;  %v98_v39 = vand.u32 2147483647, %v318_v21 }
  0x19   :  { %v74_v24 = vadd.f32 1.0, %v320_v22  ;;  %v324_v25 = vpop.eup %222  ;;  %v77_v44 = vmul.f32 -0.5, %v320_v22  ;;  %v80_v58 = vand.u32 2147483647, %v320_v22 }
  0x1a   :  { %226 = vrcp.f32 %v92_v23  ;;  %v101_v26 = vadd.f32 1.0, %v324_v25  ;;  %v327_v27 = vpop.eup %224  ;;  %v104_v47 = vmul.f32 -0.5, %v324_v25  ;;  %v96_v55 = vadd.f32 1.0, %v95_v37 }
  0x1b   :  { %228 = vrcp.f32 %v74_v24  ;;  %v83_v28 = vadd.f32 1.0, %v327_v27  ;;  %vm353_vm6 = vcmp.lt.f32.partialorder %v98_v39, 0.0004427343  ;;  %v78_v59 = vadd.f32 1.0, %v77_v44 }
  0x1c   :  { %230 = vrcp.f32 %v101_v26  ;;  %v107_v62 = vand.u32 2147483647, %v324_v25  ;;  %v105_v2 = vadd.f32 1.0, %v104_v47  ;;  %v97_v11 = vmul.f32 %v318_v21, %v96_v55 }
  0x1d   :  { %232 = vrcp.f32 %v83_v28  ;;  %vm372_vm8 = vcmp.lt.f32.partialorder %v80_v58, 0.0004427343  ;;  %v86_v16 = vmul.f32 -0.5, %v327_v27  ;;  %v79_v19 = vmul.f32 %v320_v22, %v78_v59 }
  0x1e   :  { %234 = vlog2.f32 %v92_v23  ;;  %vm378_vm9 = vcmp.lt.f32.partialorder %v107_v62, 0.0004427343  ;;  %v106_v31 = vmul.f32 %v324_v25, %v105_v2 }
  0x1f   :  { %236 = vlog2.f32 %v74_v24  ;;  %v87_v37 = vadd.f32 1.0, %v86_v16 }
  0x20   :  { %238 = vlog2.f32 %v101_v26  ;;  %v89_v26 = vand.u32 2147483647, %v327_v27 }
  0x21   :  { %240 = vlog2.f32 %v83_v28  ;;  %v88_v56 = vmul.f32 %v327_v27, %v87_v37 }
  0x22   :  { %vm405_vm11 = vcmp.lt.f32.partialorder %v89_v26, 0.0004427343 }
  0x27   :  { %v227_v29 = vpop.eup %226 }
  0x28   :  { %v229_v30 = vpop.eup %228  ;;  %v132_v32 = vmul.f32 %v227_v29, %v318_v21 }
  0x29   :  { %v130_v33 = vmul.f32 %v229_v30, %v320_v22  ;;  %v231_v34 = vpop.eup %230 }
  0x2a   :  { %v136_v40 = vsel %vm128_vm0, %v227_v29, %v132_v32  ;;  %v133_v46 = vmul.f32 %v231_v34, %v324_v25  ;;  %v233_v49 = vpop.eup %232 }
  0x2b   :  { %v134_v41 = vsel %vm126_vm1, %v229_v30, %v130_v33  ;;  %v144_v52 = vsub.f32 1.0, %v136_v40  ;;  %v235_v0 = vpop.eup %234  ;;  %v131_v3 = vmul.f32 %v233_v49, %v327_v27 }
  0x2c   :  { %v142_v54 = vsub.f32 1.0, %v134_v41  ;;  %v137_v63 = vsel %vm129_vm2, %v231_v34, %v133_v46  ;;  %v237_v17 = vpop.eup %236  ;;  %v94_v18 = vmul.f32 0.6931472, %v235_v0 }
  0x2d   :  { %v145_v13 = vsub.f32 1.0, %v137_v63  ;;  %v135_v28 = vsel %vm127_vm3, %v233_v49, %v131_v3  ;;  %v239_v29 = vpop.eup %238  ;;  %v76_v32 = vmul.f32 0.6931472, %v237_v17 }
  0x2e   :  { %v241_v39 = vpop.eup %240  ;;  %v103_v46 = vmul.f32 0.6931472, %v239_v29 }
  0x2f   :  { %v82_v55 = vsel %vm372_vm8, %v79_v19, %v76_v32 }
  0x7d   :  { %v30_v42 = vpop.permute.xlu1 %29  ;;  %v24_v43 = vpop.permute.xlu0 %23 }
  0x7e   :  { %vm36_vm4 = vcmp.eq.s32.totalorder %v334_v35, %v30_v42  ;;  %vm34_vm5 = vcmp.eq.s32.totalorder %v334_v35, %v24_v43  ;;  %v143_v43 = vsub.f32 1.0, %v135_v28 }
  0x7f   :  { %v349_v51 = vsel %vm36_vm4, 1.0, %v265_v50  ;;  %v351_v53 = vsel %vm34_vm5, 1.0, %v265_v50 }
  0x80   :  { %v148_v57 = vsub.f32 1.0, %v349_v51  ;;  %v146_v60 = vsub.f32 1.0, %v351_v53  ;;  %v140_v1 = vmul.f32 %v349_v51, %v136_v40  ;;  %v138_v7 = vmul.f32 %v351_v53, %v134_v41 }
  0x81   :  { %v33_v61 = vpop.permute.xlu1 %32  ;;  %v27_v15 = vpop.permute.xlu0 %26  ;;  %v68_v21 = vmul.f32 %v349_v51, %v297_v5  ;;  %v66_v22 = vmul.f32 %v351_v53, %v302_v6  ;;  %v100_v40 = vsel %vm353_vm6, %v97_v11, %v94_v18  ;;  %v172_v3 = vmul.f32 0.25, %v349_v51 }
  0x82   :  { %vm37_vm7 = vcmp.eq.s32.totalorder %v334_v35, %v33_v61  ;;  %v152_v4 = vmul.f32 %v148_v57, %v144_v52  ;;  %v150_v8 = vmul.f32 %v146_v60, %v142_v54  ;;  %vm35_vm10 = vcmp.eq.s32.totalorder %v334_v35, %v27_v15 }
  0x83   :  { %v369_v10 = vsel %vm37_vm7, 1.0, %v265_v50  ;;  %v210_v42 = vsel %vm35_vm10, 1.0, %v265_v50  ;;  %v72_v44 = vsub.f32 %v64_v36, %v68_v21  ;;  %v70_v49 = vsub.f32 %v62_v38, %v66_v22 }
  0x84   :  { %v154_v20 = vadd.f32 %v150_v8, %v138_v7  ;;  %v149_v24 = vsub.f32 1.0, %v369_v10  ;;  %v156_v30 = vadd.f32 %v152_v4, %v140_v1  ;;  %v141_v33 = vmul.f32 %v369_v10, %v137_v63 }
  0x85   :  { %v69_v25 = vmul.f32 %v369_v10, %v309_v9  ;;  %v67_v52 = vmul.f32 %v210_v42, %v315_v14  ;;  %v147_v54 = vsub.f32 1.0, %v210_v42  ;;  %v85_v50 = vmul.f32 0.6931472, %v241_v39 }
  0x86   :  { %v153_v34 = vmul.f32 %v149_v24, %v145_v13  ;;  %v158_v41 = vsub.f32 1.0, %v154_v20  ;;  %v160_v47 = vsub.f32 1.0, %v156_v30  ;;  %v139_v59 = vmul.f32 %v210_v42, %v135_v28 }
  0x87   :  { %v151_v61 = vmul.f32 %v147_v54, %v143_v43  ;;  %v112_v62 = vadd.f32 %v100_v40, %v72_v44  ;;  %v174_v6 = vmul.f32 0.75, %v146_v60  ;;  %v73_v38 = vsub.f32 %v65_v45, %v69_v25 }
  0x88   :  { %v157_v35 = vadd.f32 %v153_v34, %v141_v33  ;;  %v162_v36 = vmul.f32 %v158_v41, %v158_v41  ;;  %v109_v63 = vsel %vm378_vm9, %v106_v31, %v103_v46  ;;  %v164_v0 = vmul.f32 %v160_v47, %v160_v47 }
  0x89   :  { %v110_v1 = vadd.f32 %v82_v55, %v70_v49  ;;  %v71_v27 = vsub.f32 %v63_v48, %v67_v52  ;;  %v155_v2 = vadd.f32 %v151_v61, %v139_v59  ;;  %v176_v4 = vmul.f32 0.75, %v148_v57 }
  0x8a   :  { %v161_v58 = vsub.f32 1.0, %v157_v35  ;;  %v170_v7 = vmul.f32 0.25, %v351_v53  ;;  %v91_v9 = vsel %vm405_vm11, %v88_v56, %v85_v50  ;;  %v175_v11 = vmul.f32 0.75, %v147_v54 }
  0x8b   :  { %v166_v45 = vmul.f32 %v162_v36, %v110_v1  ;;  %v159_v8 = vsub.f32 1.0, %v155_v2  ;;  %v113_v13 = vadd.f32 %v109_v63, %v73_v38  ;;  %v177_v15 = vmul.f32 0.75, %v149_v24 }
  0x8c   :  { %v165_v60 = vmul.f32 %v161_v58, %v161_v58  ;;  %v178_v12 = vadd.f32 %v174_v6, %v170_v7  ;;  %v168_v14 = vmul.f32 %v164_v0, %v112_v62  ;;  %v111_v48 = vadd.f32 %v91_v9, %v71_v27 }
  0x8d   :  { %v163_v16 = vmul.f32 %v159_v8, %v159_v8  ;;  %v171_v17 = vmul.f32 0.25, %v210_v42  ;;  %v180_v18 = vadd.f32 %v176_v4, %v172_v3  ;;  %v173_v51 = vmul.f32 0.25, %v369_v10 }
  0x8e   :  { %v182_v57 = vmul.f32 %v178_v12, %v166_v45  ;;  %v169_v20 = vmul.f32 %v165_v60, %v113_v13 }
  0x8f   :  { %v167_v19 = vmul.f32 %v163_v16, %v111_v48  ;;  %v179_v53 = vadd.f32 %v175_v11, %v171_v17  ;;  %v181_v23 = vadd.f32 %v177_v15, %v173_v51  ;;  %v184_v26 = vmul.f32 %v180_v18, %v168_v14 }
  0x90   :  { %v187_v29 = vsel %vm186_vm12, %v182_v57, 0.0 }
  0x91   :  { %v183_v21 = vmul.f32 %v179_v53, %v167_v19  ;;  %v185_v28 = vmul.f32 %v181_v23, %v169_v20  ;;  %v190_v24 = vsel %vm186_vm12, %v184_v26, 0.0 }
  0x93   :  { %v188_v30 = vsel %vm186_vm12, %v183_v21, 0.0  ;;  %v192_v32 = vsel %vm186_vm12, %v185_v28, 0.0 }
  0x94   :  { %v189_v22 = vadd.f32 %v188_v30, %v187_v29 }
  0x96   :  { %v191_v31 = vadd.f32 %v190_v24, %v189_v22 }
  0x98   :  { %v193_v33 = vadd.f32 %v192_v32, %v191_v31 }
  0x9a   :  { %194 = vst.msk [vmem:[#allocation2] sm:$0xff] %vm186_vm12, %v193_v33 }
  0x9b   :  { %253 = shalt.err (!%p250_p4)
}
  0x9c   :  { %204 = dma.vmem_to_hbm [thread:$0]  %s202_s24, 128, %s427_s2, [#allocation3]  }
  0x9d   :  { %262 = dma.done.wait [#allocation3], 128  }
  0x9e   :  { %263 = vsyncadd [#allocation3], 4294967168 }
  0x9f   :  { %208 = vsyncpa [#allocation3], 1 }

</bundles_post_ra>
